<compile_context>
chip_gen: v6e
topology: v6e:2x2x1
jax: 0.10.0
libtpu: 0.0.40
codegen_flags: <defaults>
</compile_context>

<pallas_src>
import functools

import jax
import jax.numpy as jnp
from jax.experimental import pallas as pl
from jax.experimental.pallas import tpu as pltpu

_LANE = 128            # TPU lane width: pad channel dims to this for lane-dense tiles
_TARGET_ROWS = 2048    # rows (bt*S) per grid step: amortize per-step pipeline overhead
_VMEM_BUDGET = 24 << 20  # per-step working-set budget (comfortable on v7x's 64 MiB VMEM)


def attnet_kernel(x_ref, xsum_ref, wemb_ref, bemb_ref, winn_ref, binn_ref,
                  wout_ref, wres_ref, cout_ref, out_ref, *, seq_len):
    m = x_ref.shape[0]               # m = bt * seq_len rows (flattened in the wrapper)
    bt = m // seq_len
    cdt = wemb_ref.dtype             # MXU operand dtype (bf16 or f32); accumulate in f32

    # emb + emb_bn + mha_bn folded into one affine:  h2 = x @ W' + b'   (M, Ep), f32
    h2 = jnp.dot(x_ref[...], wemb_ref[...],
                 preferred_element_type=jnp.float32) + bemb_ref[...]

    # TODO(synk): MultiheadAttention output is dead code in the reference forward
    # (overwritten before use), so it is intentionally not computed here.

    # relu(self.inner(.)) : (M, Fp), f32 accumulation, f32 elementwise
    inner = jnp.dot(h2.astype(cdt), winn_ref[...],
                    preferred_element_type=jnp.float32) + binn_ref[...]
    inner = jnp.maximum(inner, 0.0)

    # Per-batch sum over the sequence axis, hoisted above the outer projection
    # (exact: the outer matmul + final affine distribute over the row sum).
    inner_sum = jnp.sum(inner.reshape(bt, seq_len, inner.shape[-1]), axis=1)  # (bt, Fp)

    # outer + residual + ff_bn, all folded in the wrapper:
    #   out[b] = inner_sum[b] @ (W_out*s3) + x_sum[b] @ (W_emb'*s3) + c_out
    out = jnp.dot(inner_sum.astype(cdt), wout_ref[...],
                  preferred_element_type=jnp.float32)
    out = out + jnp.dot(xsum_ref[...], wres_ref[...],
                        preferred_element_type=jnp.float32)
    out = out + cout_ref[...]
    out_ref[...] = out.astype(out_ref.dtype)                                  # (bt, Ep)


def _pad_dim(a, axis, mult):
    pad = (-a.shape[axis]) % mult
    if pad:
        widths = [(0, 0)] * a.ndim
        widths[axis] = (0, pad)
        a = jnp.pad(a, widths)
    return a


def _vmem_bytes(bt, s, t, ep, fp, op_itemsize):
    """Rough per-step VMEM working-set estimate (double-buffered blocks + spills)."""
    m = bt * s
    x_blk = 2 * m * t * op_itemsize
    xsum_blk = 2 * bt * t * op_itemsize
    out_blk = 2 * bt * ep * 4
    weights = 2 * ((t * ep * 2 + ep * fp + fp * ep) * op_itemsize + (3 * ep + fp) * 4)
    interm = 3 * m * max(ep, fp) * 4        # h2 / relu(inner) f32 spill headroom
    return x_blk + xsum_blk + out_blk + weights + interm


def fold_params(params, seq_len, compute_dtype=jnp.bfloat16, lane=_LANE):
    """Fold eval-mode BN / bias affines into the weights and zero-pad channel dims."""
    s1, t1 = params["s1"], params["t1"]
    s2, t2 = params["s2"], params["t2"]
    s3, t3 = params["s3"], params["t3"]

    w_emb = params["w_emb_t"] * (s1 * s2)                         # (T, E)
    b_emb = (params["b_emb"] * s1 + t1) * s2 + t2                 # (1, E)
    w_inner = params["w_inner_t"]                                 # (E, F)
    b_inner = params["b_inner"]                                   # (1, F)
    w_outer = params["w_outer_t"] * s3                            # (F, E)
    w_res = w_emb * s3                                            # (T, E)  residual path
    c_out = float(seq_len) * (b_emb * s3 + params["b_outer"] * s3 + t3)   # (1, E)

    # Zero-pad E and F to the lane width so matmul results and the output store are
    # lane-dense (padded columns stay exactly zero end-to-end).
    w_emb = _pad_dim(w_emb, 1, lane)
    b_emb = _pad_dim(b_emb, 1, lane)
    w_inner = _pad_dim(_pad_dim(w_inner, 0, lane), 1, lane)
    b_inner = _pad_dim(b_inner, 1, lane)
    w_outer = _pad_dim(_pad_dim(w_outer, 0, lane), 1, lane)
    w_res = _pad_dim(w_res, 1, lane)
    c_out = _pad_dim(c_out, 1, lane)

    return dict(
        w_emb=w_emb.astype(compute_dtype), b_emb=b_emb.astype(jnp.float32),
        w_inner=w_inner.astype(compute_dtype), b_inner=b_inner.astype(jnp.float32),
        w_outer=w_outer.astype(compute_dtype), w_res=w_res.astype(compute_dtype),
        c_out=c_out.astype(jnp.float32),
    )


def attnet_forward(x, params, compute_dtype=jnp.bfloat16, batch_tile=None):
    B, S, T = x.shape
    E = params["w_emb_t"].shape[1]
    fp = fold_params(params, S, compute_dtype=compute_dtype)
    Ep = fp["w_emb"].shape[1]
    Fp = fp["w_inner"].shape[1]
    itemsize = jnp.dtype(compute_dtype).itemsize

    # --- batch-tile selection ------------------------------------------------
    if batch_tile is not None:
        bt = max(8, ((int(batch_tile) + 7) // 8) * 8)
    else:
        bt = max(8, _TARGET_ROWS // max(S, 1))
        bt = ((bt + 7) // 8) * 8
        if B >= 16:
            # Keep grid >= 2 so dimension_semantics=("parallel",) can shard the grid
            # across v7x's two TensorCores instead of idling one of them.
            cap = ((-(-B // 2) + 7) // 8) * 8
            bt = min(bt, max(cap, 8))
        bt = min(bt, ((B + 7) // 8) * 8)          # don't exceed the (padded) batch
        # Shrink if the per-step working set would exceed the VMEM budget (v7x: 64 MiB).
        while bt > 8 and _vmem_bytes(bt, S, T, Ep, Fp, itemsize) > _VMEM_BUDGET:
            bt = max(8, (((bt // 2) + 7) // 8) * 8)
    n_blocks = -(-B // bt)
    Bp = n_blocks * bt

    # --- input prep (ideally x already arrives in compute_dtype upstream) ----
    if Bp != B:
        x = jnp.pad(x, ((0, Bp - B), (0, 0), (0, 0)))
    x_sum = jnp.sum(x, axis=1).astype(compute_dtype)            # (Bp, T) residual input
    x_flat = x.reshape(Bp * S, T).astype(compute_dtype)         # free row-major reshape

    flops = 2 * Bp * S * (T * Ep + Ep * Fp) + 2 * Bp * (Fp * Ep + T * Ep)
    bytes_accessed = int(
        Bp * S * T * itemsize + Bp * T * itemsize
        + sum(int(v.size) * v.dtype.itemsize for v in fp.values())
        + Bp * Ep * 4)
    cost = pl.CostEstimate(flops=int(flops), transcendentals=0,
                           bytes_accessed=bytes_accessed)

    vmem_limit = int(min(48 << 20,
                         max(32 << 20, 2 * _vmem_bytes(bt, S, T, Ep, Fp, itemsize))))

    def const_spec(a):
        # Whole-array block with a constant index_map: the pipeline keeps it
        # resident across grid steps (no per-step re-DMA of the weights).
        shape = a.shape
        return pl.BlockSpec(shape, lambda b: (0,) * len(shape))

    kernel = functools.partial(attnet_kernel, seq_len=S)

    out = pl.pallas_call(
        kernel,
        out_shape=jax.ShapeDtypeStruct((Bp, Ep), jnp.float32),
        grid_spec=pltpu.PrefetchScalarGridSpec(
            num_scalar_prefetch=0,
            grid=(n_blocks,),
            in_specs=[
                # x slab: flattened rows, 2-D block (no in-kernel reshape of the ref).
                # (Add pipeline_mode=pl.Buffered(3) here if profiling shows exposed DMA.)
                pl.BlockSpec((bt * S, T), lambda b: (b, 0)),
                pl.BlockSpec((bt, T), lambda b: (b, 0)),        # x_sum (residual path)
                const_spec(fp["w_emb"]), const_spec(fp["b_emb"]),
                const_spec(fp["w_inner"]), const_spec(fp["b_inner"]),
                const_spec(fp["w_outer"]), const_spec(fp["w_res"]),
                const_spec(fp["c_out"]),
            ],
            out_specs=pl.BlockSpec((bt, Ep), lambda b: (b, 0)),  # lane-dense output
        ),
        compiler_params=pltpu.CompilerParams(
            dimension_semantics=("parallel",),
            vmem_limit_bytes=vmem_limit),
        cost_estimate=cost,
    )(x_flat, x_sum,
      fp["w_emb"], fp["b_emb"], fp["w_inner"], fp["b_inner"],
      fp["w_outer"], fp["w_res"], fp["c_out"])
    return out[:B, :E]


def attnet_ref(x, params):
    """Pure-JAX reference for correctness checking (unfolded, f32)."""
    h = jnp.einsum("bst,te->bse", x, params["w_emb_t"]) + params["b_emb"]
    h = h * params["s1"] + params["t1"]
    h2 = h * params["s2"] + params["t2"]
    inner = jnp.maximum(
        jnp.einsum("bse,ef->bsf", h2, params["w_inner_t"]) + params["b_inner"], 0.0)
    out = jnp.einsum("bsf,fe->bse", inner, params["w_outer_t"]) + params["b_outer"]
    out = out + h2
    out = out * params["s3"] + params["t3"]
    return jnp.sum(out, axis=1)


def init_params(key, trip_emb, embed_dim, filter_inner, eps=1e-5):
    k1, k2, k3, k4, k5, k6 = jax.random.split(key, 6)
    # emb.weight: xavier_normal_ on Conv1d weight [E, T, 1] -> std = sqrt(2/(T+E))
    std_emb = (2.0 / (trip_emb + embed_dim)) ** 0.5
    w_emb = std_emb * jax.random.normal(k1, (embed_dim, trip_emb), jnp.float32)
    b_emb = 0.01 * jax.random.normal(k2, (1, embed_dim), jnp.float32)
    w_inner = (1.0 / embed_dim) ** 0.5 * jax.random.normal(
        k3, (filter_inner, embed_dim), jnp.float32)
    b_inner = 0.01 * jax.random.normal(k4, (1, filter_inner), jnp.float32)
    w_outer = (1.0 / filter_inner) ** 0.5 * jax.random.normal(
        k5, (embed_dim, filter_inner), jnp.float32)
    b_outer = 0.01 * jax.random.normal(k6, (1, embed_dim), jnp.float32)
    # BatchNorm1d in eval mode with fresh stats: y = (x - 0)/sqrt(1+eps) * 1 + 0
    bn_scale = jnp.full((1, embed_dim), 1.0 / (1.0 + eps) ** 0.5, jnp.float32)
    bn_shift = jnp.zeros((1, embed_dim), jnp.float32)
    return dict(
        w_emb_t=jnp.transpose(w_emb), b_emb=b_emb,
        w_inner_t=jnp.transpose(w_inner), b_inner=b_inner,
        w_outer_t=jnp.transpose(w_outer), b_outer=b_outer,
        s1=bn_scale, t1=bn_shift,
        s2=bn_scale, t2=bn_shift,
        s3=bn_scale, t3=bn_shift,
    )


if __name__ == "__main__":
    B, S, T, E, F = 2, 8, 16, 32, 64  # batch, seq, trip_emb, embed_dim, filter_inner
    key = jax.random.PRNGKey(0)
    kx, kp = jax.random.split(key)
    x = jax.random.normal(kx, (B, S, T), jnp.float32)
    params = init_params(kp, T, E, F)

    ref = attnet_ref(x, params)

    # Strict f32-operand path.
    out_f32 = jax.block_until_ready(attnet_forward(x, params, jnp.float32))
    assert out_f32.shape == (B, E), out_f32.shape
    assert jnp.allclose(out_f32, ref, atol=2e-3, rtol=2e-3), "f32 mismatch vs JAX reference"

    # Default bf16-operand path (f32 accumulation) — used on v5e/v6e/v7x alike.
    out_bf16 = jax.block_until_ready(attnet_forward(x, params))
    assert out_bf16.shape == (B, E), out_bf16.shape
    assert jnp.allclose(out_bf16, ref, atol=1e-1, rtol=1e-1), "bf16 mismatch vs JAX reference"

    print("KERNEL_OK")
</pallas_src>

<mosaic_0001>
module attributes {stable_mosaic.version = 11 : i64} {
  func.func @attnet_kernel(%arg0: i32, %arg1: memref<64x16xf32, #tpu.memory_space<vmem>>, %arg2: memref<8x16xf32, #tpu.memory_space<vmem>>, %arg3: memref<16x128xf32, #tpu.memory_space<vmem>>, %arg4: memref<1x128xf32, #tpu.memory_space<vmem>>, %arg5: memref<128x128xf32, #tpu.memory_space<vmem>>, %arg6: memref<1x128xf32, #tpu.memory_space<vmem>>, %arg7: memref<128x128xf32, #tpu.memory_space<vmem>>, %arg8: memref<16x128xf32, #tpu.memory_space<vmem>>, %arg9: memref<1x128xf32, #tpu.memory_space<vmem>>, %arg10: memref<8x128xf32, #tpu.memory_space<vmem>>) attributes {dimension_semantics = [#tpu.dimension_semantics<parallel>], iteration_bounds = array<i64: 1>, scalar_prefetch = 0 : i64, scratch_operands = 0 : i64, tpu.core_type = #tpu.core_type<tc>, window_params = [{transform_indices = @transform_0, window_bounds = array<i64: 64, 16>}, {transform_indices = @transform_1, window_bounds = array<i64: 8, 16>}, {pipeline_mode = #tpu.pipeline_mode<synchronous>, transform_indices = @transform_2, window_bounds = array<i64: 16, 128>}, {pipeline_mode = #tpu.pipeline_mode<synchronous>, transform_indices = @transform_3, window_bounds = array<i64: 1, 128>}, {pipeline_mode = #tpu.pipeline_mode<synchronous>, transform_indices = @transform_4, window_bounds = array<i64: 128, 128>}, {pipeline_mode = #tpu.pipeline_mode<synchronous>, transform_indices = @transform_5, window_bounds = array<i64: 1, 128>}, {pipeline_mode = #tpu.pipeline_mode<synchronous>, transform_indices = @transform_6, window_bounds = array<i64: 128, 128>}, {pipeline_mode = #tpu.pipeline_mode<synchronous>, transform_indices = @transform_7, window_bounds = array<i64: 16, 128>}, {pipeline_mode = #tpu.pipeline_mode<synchronous>, transform_indices = @transform_8, window_bounds = array<i64: 1, 128>}, {transform_indices = @transform_9, window_bounds = array<i64: 8, 128>}]} {
    %c0 = arith.constant 0 : index
    %c0_0 = arith.constant 0 : index
    %0 = vector.load %arg1[%c0, %c0_0] : memref<64x16xf32, #tpu.memory_space<vmem>>, vector<64x16xf32>
    %c0_1 = arith.constant 0 : index
    %c0_2 = arith.constant 0 : index
    %1 = vector.load %arg3[%c0_1, %c0_2] : memref<16x128xf32, #tpu.memory_space<vmem>>, vector<16x128xf32>
    %cst = arith.constant dense<0.000000e+00> : vector<64x128xf32>
    %2 = tpu.matmul %0, %1, %cst {dimension_numbers = #tpu.dot_dimension_numbers<[1], [0], [0], [1], [0, 0, 1, 1], [], []>} : vector<64x16xf32>, vector<16x128xf32>, vector<64x128xf32> -> vector<64x128xf32>
    %c0_3 = arith.constant 0 : index
    %c0_4 = arith.constant 0 : index
    %3 = vector.load %arg4[%c0_3, %c0_4] : memref<1x128xf32, #tpu.memory_space<vmem>>, vector<1x128xf32>
    %4 = vector.broadcast %3 : vector<1x128xf32> to vector<64x128xf32>
    %5 = arith.addf %2, %4 : vector<64x128xf32>
    %c0_5 = arith.constant 0 : index
    %c0_6 = arith.constant 0 : index
    %6 = vector.load %arg5[%c0_5, %c0_6] : memref<128x128xf32, #tpu.memory_space<vmem>>, vector<128x128xf32>
    %cst_7 = arith.constant dense<0.000000e+00> : vector<64x128xf32>
    %7 = tpu.matmul %5, %6, %cst_7 {dimension_numbers = #tpu.dot_dimension_numbers<[1], [0], [0], [1], [0, 0, 1, 1], [], []>} : vector<64x128xf32>, vector<128x128xf32>, vector<64x128xf32> -> vector<64x128xf32>
    %c0_8 = arith.constant 0 : index
    %c0_9 = arith.constant 0 : index
    %8 = vector.load %arg6[%c0_8, %c0_9] : memref<1x128xf32, #tpu.memory_space<vmem>>, vector<1x128xf32>
    %9 = vector.broadcast %8 : vector<1x128xf32> to vector<64x128xf32>
    %10 = arith.addf %7, %9 : vector<64x128xf32>
    %cst_10 = arith.constant 0.000000e+00 : f32
    %11 = vector.broadcast %cst_10 : f32 to vector<64x128xf32>
    %12 = arith.maximumf %10, %11 : vector<64x128xf32>
    %13 = vector.shape_cast %12 : vector<64x128xf32> to vector<8x8x128xf32>
    %cst_11 = arith.constant dense<0.000000e+00> : vector<8x128xf32>
    %14 = vector.multi_reduction <add>, %13, %cst_11 [1] : vector<8x8x128xf32> to vector<8x128xf32>
    %c0_12 = arith.constant 0 : index
    %c0_13 = arith.constant 0 : index
    %15 = vector.load %arg7[%c0_12, %c0_13] : memref<128x128xf32, #tpu.memory_space<vmem>>, vector<128x128xf32>
    %cst_14 = arith.constant dense<0.000000e+00> : vector<8x128xf32>
    %16 = tpu.matmul %14, %15, %cst_14 {dimension_numbers = #tpu.dot_dimension_numbers<[1], [0], [0], [1], [0, 0, 1, 1], [], []>} : vector<8x128xf32>, vector<128x128xf32>, vector<8x128xf32> -> vector<8x128xf32>
    %c0_15 = arith.constant 0 : index
    %c0_16 = arith.constant 0 : index
    %17 = vector.load %arg2[%c0_15, %c0_16] : memref<8x16xf32, #tpu.memory_space<vmem>>, vector<8x16xf32>
    %c0_17 = arith.constant 0 : index
    %c0_18 = arith.constant 0 : index
    %18 = vector.load %arg8[%c0_17, %c0_18] : memref<16x128xf32, #tpu.memory_space<vmem>>, vector<16x128xf32>
    %cst_19 = arith.constant dense<0.000000e+00> : vector<8x128xf32>
    %19 = tpu.matmul %17, %18, %cst_19 {dimension_numbers = #tpu.dot_dimension_numbers<[1], [0], [0], [1], [0, 0, 1, 1], [], []>} : vector<8x16xf32>, vector<16x128xf32>, vector<8x128xf32> -> vector<8x128xf32>
    %20 = arith.addf %16, %19 : vector<8x128xf32>
    %c0_20 = arith.constant 0 : index
    %c0_21 = arith.constant 0 : index
    %21 = vector.load %arg9[%c0_20, %c0_21] : memref<1x128xf32, #tpu.memory_space<vmem>>, vector<1x128xf32>
    %22 = vector.broadcast %21 : vector<1x128xf32> to vector<8x128xf32>
    %23 = arith.addf %20, %22 : vector<8x128xf32>
    %c0_22 = arith.constant 0 : index
    %c0_23 = arith.constant 0 : index
    %24 = vector.load %arg10[%c0_22, %c0_23] : memref<8x128xf32, #tpu.memory_space<vmem>>, vector<8x128xf32>
    tpu.vector_store %arg10[%c0_22, %c0_23], %23 {strides = array<i32>} : memref<8x128xf32, #tpu.memory_space<vmem>>, vector<8x128xf32>,
    return
  }
  func.func @transform_0(%arg0: i32) -> (i32, i32) {
    %c0_i32 = arith.constant 0 : i32
    %c0_i32_0 = arith.constant 0 : i32
    return %arg0, %c0_i32 : i32, i32
  }
  func.func @transform_1(%arg0: i32) -> (i32, i32) {
    %c0_i32 = arith.constant 0 : i32
    %c0_i32_0 = arith.constant 0 : i32
    return %arg0, %c0_i32 : i32, i32
  }
  func.func @transform_2(%arg0: i32) -> (i32, i32) {
    %c0_i32 = arith.constant 0 : i32
    %c0_i32_0 = arith.constant 0 : i32
    %c0_i32_1 = arith.constant 0 : i32
    return %c0_i32, %c0_i32_0 : i32, i32
  }
  func.func @transform_3(%arg0: i32) -> (i32, i32) {
    %c0_i32 = arith.constant 0 : i32
    %c0_i32_0 = arith.constant 0 : i32
    %c0_i32_1 = arith.constant 0 : i32
    return %c0_i32, %c0_i32_0 : i32, i32
  }
  func.func @transform_4(%arg0: i32) -> (i32, i32) {
    %c0_i32 = arith.constant 0 : i32
    %c0_i32_0 = arith.constant 0 : i32
    %c0_i32_1 = arith.constant 0 : i32
    return %c0_i32, %c0_i32_0 : i32, i32
  }
  func.func @transform_5(%arg0: i32) -> (i32, i32) {
    %c0_i32 = arith.constant 0 : i32
    %c0_i32_0 = arith.constant 0 : i32
    %c0_i32_1 = arith.constant 0 : i32
    return %c0_i32, %c0_i32_0 : i32, i32
  }
  func.func @transform_6(%arg0: i32) -> (i32, i32) {
    %c0_i32 = arith.constant 0 : i32
    %c0_i32_0 = arith.constant 0 : i32
    %c0_i32_1 = arith.constant 0 : i32
    return %c0_i32, %c0_i32_0 : i32, i32
  }
  func.func @transform_7(%arg0: i32) -> (i32, i32) {
    %c0_i32 = arith.constant 0 : i32
    %c0_i32_0 = arith.constant 0 : i32
    %c0_i32_1 = arith.constant 0 : i32
    return %c0_i32, %c0_i32_0 : i32, i32
  }
  func.func @transform_8(%arg0: i32) -> (i32, i32) {
    %c0_i32 = arith.constant 0 : i32
    %c0_i32_0 = arith.constant 0 : i32
    %c0_i32_1 = arith.constant 0 : i32
    return %c0_i32, %c0_i32_0 : i32, i32
  }
  func.func @transform_9(%arg0: i32) -> (i32, i32) {
    %c0_i32 = arith.constant 0 : i32
    %c0_i32_0 = arith.constant 0 : i32
    return %arg0, %c0_i32 : i32, i32
  }
}

</mosaic_0001>

<bundles_post_ra>
// kernel: tpu_custom_call.1
= control target key start
LH: loop header
LB: loop body
LE: loop exit
PB: predicated region body
PF: predicated region fallthrough
CT: control target
= control target key end

     0   :  { %14 = vsyncpa [#allocation3], 0  ;;  %s988_s0 = inlined_call_operand.vmem [shape: f32[64,16], index: 0, kind: input, shape index: {}]   ;;  %s989_s1 = inlined_call_operand.vmem [shape: f32[8,16], index: 1, kind: input, shape index: {}]   ;;  %s990_s2 = inlined_call_operand.vmem [shape: f32[16,128], index: 2, kind: input, shape index: {}]   ;;  %s991_s3 = inlined_call_operand.vmem [shape: f32[1,128], index: 3, kind: input, shape index: {}]   ;;  %s992_s4 = inlined_call_operand.hbm [shape: f32[128,128], index: 4, kind: input, shape index: {}]   ;;  %s993_s5 = inlined_call_operand.vmem [shape: f32[1,128], index: 5, kind: input, shape index: {}]   ;;  %s994_s6 = inlined_call_operand.hbm [shape: f32[128,128], index: 6, kind: input, shape index: {}]   ;;  %s995_s7 = inlined_call_operand.vmem [shape: f32[16,128], index: 7, kind: input, shape index: {}]   ;;  %s996_s8 = inlined_call_operand.vmem [shape: f32[1,128], index: 8, kind: input, shape index: {}]   ;;  %s997_s9 = inlined_call_operand.hbm [shape: f32[8,128], index: 9, kind: output, shape index: {}]  }
   0x1   :  { %15 = vsyncpa [#allocation6], 0 }
   0x2   :  { %16 = vsyncpa [#allocation4], 0  ;;  %s843_s30 = smov [#allocation2]  }
   0x3   :  { %s30_s10 = sshll.u32 %s843_s30, 4  ;;  %s31_s10 = int_to_ptr.vmem [resolvable:$true] %s30_s10 }
   0x4   :  { %s785_s11 = scalar_lea.vmem %s31_s10, 2048  ;;  %p790_p1 = scmp.lt.s32.totalorder %s31_s10, %s31_s10 }
   0x5   :  { %p786_p0 = scmp.ne.s32.totalorder %s31_s10, %s785_s11  ;;  %p791_p2 = scmp.lt.s32.totalorder %s785_s11, %s785_s11 }
   0x7   :  { %p792_p3 = por %p791_p2, %p790_p1 }
   0x9   :  { %p793_p4 = pnand %p792_p3, %p786_p0 }
   0xb   :  { %796 = shalt.err (!%p793_p4)
}
   0xc   :  { %s844_s12 = smov 128   ;;  %s845_s13 = smov 8  }
   0xd   :  { %36 = dma.hbm_to_vmem [thread:$0]  %s992_s4, 2048, %s31_s10, [#allocation3], %s844_s12, %s844_s12, %s845_s13  }
   0xe   :  { %s846_s16 = smov [#allocation5]  }
   0xf   :  { %s44_s17 = sshll.u32 %s846_s16, 4  ;;  %s45_s17 = int_to_ptr.vmem [resolvable:$true] %s44_s17 }
  0x10   :  { %s805_s18 = scalar_lea.vmem %s45_s17, 2048  ;;  %p810_p6 = scmp.lt.s32.totalorder %s45_s17, %s45_s17 }
  0x11   :  { %p806_p5 = scmp.ne.s32.totalorder %s45_s17, %s805_s18  ;;  %p811_p7 = scmp.lt.s32.totalorder %s805_s18, %s805_s18 }
  0x13   :  { %p812_p8 = por %p811_p7, %p810_p6 }
  0x15   :  { %p813_p9 = pnand %p812_p8, %p806_p5 }
  0x17   :  { %816 = shalt.err (!%p813_p9)
}
  0x18   :  { %50 = dma.hbm_to_vmem [thread:$0]  %s994_s6, 2048, %s45_s17, [#allocation6], %s844_s12, %s844_s12, %s845_s13  }
  0x19   :  { %837 = dma.done.wait [#allocation3], 2048  }
  0x1a   :  { %838 = vsyncadd [#allocation3], 4294965248 }
  0x1b   :  { %839 = dma.done.wait [#allocation6], 2048  }
  0x1c   :  { %840 = vsyncadd [#allocation6], 4294965248  ;;  %vm78_vm0 = vcmask 130048   ;;  %v70_v0 = vld [vmem:[%s990_s2 + $0x8] sm:$0xff]  ;;  %v69_v1 = vld [vmem:[%s990_s2] sm:$0xff]  ;;  %v847_v27 = vmov 0.0  }
  0x1d   :  { %v61_v2 = vld [vmem:[%s988_s0] sm:$0xff]  ;;  %668 = vmatprep.subr.mxu1 %v70_v0  ;;  %v62_v3 = vld [vmem:[%s988_s0 + $0x8] sm:$0xff]  ;;  %v63_v4 = vld [vmem:[%s988_s0 + $0x10] sm:$0xff]  ;;  %728 = vmatprep.subr.mxu0 %v847_v27  ;;  %vm848_vm1 = vmmov 0   ;;  %vm492_vm2 = vcmask 1041409   ;;  %vm494_vm3 = vcmask 1042434  }
  0x1e   :  { %672 = vmatprep.mubr.msk.f32.mxu1 %vm78_vm0, %v61_v2  ;;  %669 = vmatpush3.msra.mxu1 %v70_v0  ;;  %v223_v5 = vld [vmem:[#allocation2 + $0x78] sm:$0xff]  ;;  %v222_v6 = vld [vmem:[#allocation2 + $0x70] sm:$0xff]  ;;  %v221_v8 = vld [vmem:[#allocation2 + $0x68] sm:$0xff]  ;;  %vm496_vm4 = vcmask 1043459   ;;  %vm498_vm5 = vcmask 1044484   ;;  %vm500_vm6 = vcmask 1045509  }
  0x1f   :  { %670 = vmatprep.subr.mxu1 %v69_v1  ;;  %v64_v7 = vld [vmem:[%s988_s0 + $0x18] sm:$0xff]  ;;  %v65_v9 = vld [vmem:[%s988_s0 + $0x20] sm:$0xff]  ;;  %v66_v11 = vld [vmem:[%s988_s0 + $0x28] sm:$0xff]  ;;  %732 = vmatprep.mubr.msk.f32.mxu0 %vm848_vm1, %v847_v27  ;;  %vm502_vm7 = vcmask 1046534   ;;  %vm504_vm8 = vcmask 1047559   ;;  %s849_s23 = smov [#allocation7]  }
  0x20   :  { %671 = vmatpush3.msra.mxu1 %v69_v1  ;;  %v220_v10 = vld [vmem:[#allocation2 + $0x60] sm:$0xff]  ;;  %v219_v12 = vld [vmem:[#allocation2 + $0x58] sm:$0xff]  ;;  %v67_v13 = vld [vmem:[%s988_s0 + $0x30] sm:$0xff]  ;;  %s592_s24 = sshll.u32 %s849_s23, 4  ;;  %s593_s24 = int_to_ptr.vmem [resolvable:$true] %s592_s24 }
  0x21   :  { %673 = vmatmul.mubr.msk.f32.vlgmr.msra.gmra.mxu1 %vm78_vm0, %v62_v3  ;;  %684 = vmatprep.subr.mxu1 %v223_v5  ;;  %v218_v14 = vld [vmem:[#allocation2 + $0x50] sm:$0xff]  ;;  %v68_v15 = vld [vmem:[%s988_s0 + $0x38] sm:$0xff]  ;;  %v217_v16 = vld [vmem:[#allocation2 + $0x48] sm:$0xff]  ;;  %s817_s25 = scalar_lea.vmem %s593_s24, 128  ;;  %p822_p11 = scmp.lt.s32.totalorder %s593_s24, %s593_s24 }
  0x22   :  { %675 = vmatprep.mubr.msk.f32.mxu1 %vm78_vm0, %v63_v4  ;;  %685 = vmatpush3.msra.mxu1 %v223_v5  ;;  %v216_v17 = vld [vmem:[#allocation2 + $0x40] sm:$0xff]  ;;  %v215_v18 = vld [vmem:[#allocation2 + $0x38] sm:$0xff]  ;;  %v214_v19 = vld [vmem:[#allocation2 + $0x30] sm:$0xff]  ;;  %p818_p10 = scmp.ne.s32.totalorder %s593_s24, %s817_s25  ;;  %p823_p12 = scmp.lt.s32.totalorder %s817_s25, %s817_s25 }
  0x23   :  { %686 = vmatprep.subr.mxu1 %v222_v6  ;;  %v213_v20 = vld [vmem:[#allocation2 + $0x28] sm:$0xff]  ;;  %v212_v21 = vld [vmem:[#allocation2 + $0x20] sm:$0xff]  ;;  %v211_v22 = vld [vmem:[#allocation2 + $0x18] sm:$0xff] }
  0x24   :  { %687 = vmatpush3.msra.mxu1 %v222_v6  ;;  %v210_v23 = vld [vmem:[#allocation2 + $0x10] sm:$0xff]  ;;  %v209_v24 = vld [vmem:[#allocation2 + $0x8] sm:$0xff]  ;;  %v208_v25 = vld [vmem:[#allocation2] sm:$0xff]  ;;  %p824_p13 = por %p823_p12, %p822_p11 }
  0x25   :  { %676 = vmatmul.mubr.msk.f32.gmra.mxu1 %vm78_vm0, %v64_v7  ;;  %688 = vmatprep.subr.mxu1 %v221_v8  ;;  %v410_v26 = vld [vmem:[%s995_s7 + $0x8] sm:$0xff]  ;;  %v409_v28 = vld [vmem:[%s995_s7] sm:$0xff]  ;;  %v407_v47 = vld [vmem:[#allocation5 + $0x78] sm:$0xff] }
  0x26   :  { %678 = vmatprep.mubr.msk.f32.mxu1 %vm78_vm0, %v65_v9  ;;  %689 = vmatpush3.msra.mxu1 %v221_v8  ;;  %v602_v30 = vld [vmem:[%s991_s3] ss:$0 sm:$0xff]  ;;  %v406_v48 = vld [vmem:[#allocation5 + $0x70] sm:$0xff]  ;;  %v405_v49 = vld [vmem:[#allocation5 + $0x68] sm:$0xff]  ;;  %p825_p0 = pnand %p824_p13, %p818_p10 }
  0x27   :  { %690 = vmatprep.subr.mxu1 %v220_v10  ;;  %729 = vmatpush3.msra.mxu0 %v410_v26  ;;  %v408_v46 = vld [vmem:[%s989_s1] sm:$0xff]  ;;  %v403_v51 = vld [vmem:[#allocation5 + $0x58] sm:$0xff]  ;;  %v402_v52 = vld [vmem:[#allocation5 + $0x50] sm:$0xff] }
  0x28   :  { %691 = vmatpush3.msra.mxu1 %v220_v10  ;;  %730 = vmatprep.subr.mxu0 %v847_v27  ;;  %v404_v50 = vld [vmem:[#allocation5 + $0x60] sm:$0xff]  ;;  %v401_v53 = vld [vmem:[#allocation5 + $0x48] sm:$0xff]  ;;  %v399_v55 = vld [vmem:[#allocation5 + $0x38] sm:$0xff] }
  0x29   :  { %679 = vmatmul.mubr.msk.f32.gmra.mxu1 %vm78_vm0, %v66_v11  ;;  %692 = vmatprep.subr.mxu1 %v219_v12  ;;  %v400_v54 = vld [vmem:[#allocation5 + $0x40] sm:$0xff]  ;;  %v398_v56 = vld [vmem:[#allocation5 + $0x30] sm:$0xff]  ;;  %v397_v57 = vld [vmem:[#allocation5 + $0x28] sm:$0xff] }
  0x2a   :  { %681 = vmatprep.mubr.msk.f32.mxu1 %vm78_vm0, %v67_v13  ;;  %693 = vmatpush3.msra.mxu1 %v219_v12  ;;  %v396_v58 = vld [vmem:[#allocation5 + $0x20] sm:$0xff]  ;;  %v395_v59 = vld [vmem:[#allocation5 + $0x18] sm:$0xff]  ;;  %v394_v60 = vld [vmem:[#allocation5 + $0x10] sm:$0xff] }
  0x2b   :  { %694 = vmatprep.subr.mxu1 %v218_v14  ;;  %731 = vmatpush3.msra.mxu0 %v409_v28  ;;  %v393_v61 = vld [vmem:[#allocation5 + $0x8] sm:$0xff]  ;;  %v392_v62 = vld [vmem:[#allocation5] sm:$0xff] }
  0x2c   :  { %695 = vmatpush3.msra.mxu1 %v218_v14  ;;  %735 = vmatprep.subr.mxu0 %v847_v27  ;;  %v611_v63 = vld [vmem:[%s993_s5] ss:$0 sm:$0xff] }
  0x2d   :  { %682 = vmatmul.mubr.msk.f32.gmra.mxu1 %vm78_vm0, %v68_v15  ;;  %696 = vmatprep.subr.mxu1 %v217_v16 }
  0x2e   :  { %697 = vmatpush3.msra.mxu1 %v217_v16  ;;  %733 = vmatmul.mubr.msk.f32.vlgmr.msra.gmra.mxu0 %vm78_vm0, %v408_v46 }
  0x2f   :  { %698 = vmatprep.subr.mxu1 %v216_v17  ;;  %767 = vmatprep.mubr.msk.f32.mxu0 %vm848_vm1, %v847_v27 }
  0x30   :  { %699 = vmatpush3.msra.mxu1 %v216_v17  ;;  %736 = vmatpush3.msra.mxu0 %v407_v47 }
  0x31   :  { %700 = vmatprep.subr.mxu1 %v215_v18  ;;  %737 = vmatprep.subr.mxu0 %v847_v27 }
  0x32   :  { %701 = vmatpush3.msra.mxu1 %v215_v18  ;;  %738 = vmatpush3.msra.mxu0 %v406_v48 }
  0x33   :  { %702 = vmatprep.subr.mxu1 %v214_v19  ;;  %739 = vmatprep.subr.mxu0 %v847_v27 }
  0x34   :  { %703 = vmatpush3.msra.mxu1 %v214_v19  ;;  %740 = vmatpush3.msra.mxu0 %v405_v49 }
  0x35   :  { %704 = vmatprep.subr.mxu1 %v213_v20  ;;  %741 = vmatprep.subr.mxu0 %v847_v27 }
  0x36   :  { %705 = vmatpush3.msra.mxu1 %v213_v20  ;;  %742 = vmatpush3.msra.mxu0 %v404_v50 }
  0x37   :  { %706 = vmatprep.subr.mxu1 %v212_v21  ;;  %743 = vmatprep.subr.mxu0 %v847_v27 }
  0x38   :  { %707 = vmatpush3.msra.mxu1 %v212_v21  ;;  %744 = vmatpush3.msra.mxu0 %v403_v51 }
  0x39   :  { %708 = vmatprep.subr.mxu1 %v211_v22  ;;  %745 = vmatprep.subr.mxu0 %v847_v27 }
  0x3a   :  { %709 = vmatpush3.msra.mxu1 %v211_v22  ;;  %746 = vmatpush3.msra.mxu0 %v402_v52 }
  0x3b   :  { %710 = vmatprep.subr.mxu1 %v210_v23  ;;  %747 = vmatprep.subr.mxu0 %v847_v27 }
  0x3c   :  { %711 = vmatpush3.msra.mxu1 %v210_v23  ;;  %748 = vmatpush3.msra.mxu0 %v401_v53 }
  0x3d   :  { %712 = vmatprep.subr.mxu1 %v209_v24  ;;  %749 = vmatprep.subr.mxu0 %v847_v27 }
  0x3e   :  { %713 = vmatpush3.msra.mxu1 %v209_v24  ;;  %750 = vmatpush3.msra.mxu0 %v400_v54 }
  0x3f   :  { %714 = vmatprep.subr.mxu1 %v208_v25  ;;  %751 = vmatprep.subr.mxu0 %v847_v27 }
  0x40   :  { %715 = vmatpush3.msra.mxu1 %v208_v25  ;;  %752 = vmatpush3.msra.mxu0 %v399_v55 }
  0x41   :  { %753 = vmatprep.subr.mxu0 %v847_v27 }
  0x42   :  { %754 = vmatpush3.msra.mxu0 %v398_v56 }
  0x43   :  { %755 = vmatprep.subr.mxu0 %v847_v27 }
  0x44   :  { %756 = vmatpush3.msra.mxu0 %v397_v57 }
  0x45   :  { %757 = vmatprep.subr.mxu0 %v847_v27 }
  0x46   :  { %758 = vmatpush3.msra.mxu0 %v396_v58 }
  0x47   :  { %759 = vmatprep.subr.mxu0 %v847_v27 }
  0x48   :  { %760 = vmatpush3.msra.mxu0 %v395_v59 }
  0x49   :  { %761 = vmatprep.subr.mxu0 %v847_v27 }
  0x4a   :  { %762 = vmatpush3.msra.mxu0 %v394_v60 }
  0x4b   :  { %763 = vmatprep.subr.mxu0 %v847_v27 }
  0x4c   :  { %764 = vmatpush3.msra.mxu0 %v393_v61 }
  0x4d   :  { %765 = vmatprep.subr.mxu0 %v847_v27 }
  0x4e   :  { %766 = vmatpush3.msra.mxu0 %v392_v62 }
  0xe1   :  { %v674_v29 = vpop.f32.mrf.mxu1 }
  0xe2   :  { %v175_v33 = vadd.f32 %v674_v29, %v602_v30 }
  0xe3   :  { %v169_v31 = vpop.f32.mrf.mxu1 }
  0xe4   :  { %v170_v32 = vadd.f32 %v602_v30, %v169_v31 }
  0xe5   :  { %v677_v34 = vpop.f32.mrf.mxu1 }
  0xe6   :  { %716 = vmatprep.mubr.f32.mxu1 %v170_v32  ;;  %v185_v37 = vadd.f32 %v677_v34, %v602_v30 }
  0xe7   :  { %v179_v35 = vpop.f32.mrf.mxu1  ;;  %717 = vmatmul.mubr.f32.vlgmr.msra.gmra.mxu1 %v175_v33 }
  0xe8   :  { %v180_v36 = vadd.f32 %v602_v30, %v179_v35 }
  0xe9   :  { %v680_v38 = vpop.f32.mrf.mxu1 }
  0xea   :  { %719 = vmatprep.mubr.f32.mxu1 %v180_v36  ;;  %v195_v41 = vadd.f32 %v680_v38, %v602_v30 }
  0xeb   :  { %v189_v39 = vpop.f32.mrf.mxu1  ;;  %720 = vmatmul.mubr.f32.gmra.mxu1 %v185_v37 }
  0xec   :  { %v190_v40 = vadd.f32 %v602_v30, %v189_v39 }
  0xed   :  { %v683_v42 = vpop.f32.mrf.mxu1 }
  0xee   :  { %722 = vmatprep.mubr.f32.mxu1 %v190_v40  ;;  %v205_v45 = vadd.f32 %v683_v42, %v602_v30 }
  0xef   :  { %v199_v43 = vpop.f32.mrf.mxu1  ;;  %723 = vmatmul.mubr.f32.gmra.mxu1 %v195_v41 }
  0xf0   :  { %v200_v44 = vadd.f32 %v602_v30, %v199_v43 }
  0xf2   :  { %725 = vmatprep.mubr.f32.mxu1 %v200_v44 }
  0xf3   :  { %726 = vmatmul.mubr.f32.gmra.mxu1 %v205_v45 }
 0x1a7   :  { %v718_v0 = vpop.f32.mrf.mxu1 }
 0x1a8   :  { %v303_v1 = vadd.f32 %v718_v0, %v611_v63 }
 0x1a9   :  { %v297_v2 = vpop.f32.mrf.mxu1 }
 0x1aa   :  { %v337_v3 = vmax.f32 %v303_v1, 0.0  ;;  %v298_v4 = vadd.f32 %v611_v63, %v297_v2 }
 0x1ab   :  { %v721_v5 = vpop.f32.mrf.mxu1 }
 0x1ac   :  { %v350_v6 = vrot.slane %v337_v3, 4  ;;  %v336_v7 = vmax.f32 %v298_v4, 0.0  ;;  %v313_v8 = vadd.f32 %v721_v5, %v611_v63 }
 0x1ad   :  { %v307_v9 = vpop.f32.mrf.mxu1 }
 0x1ae   :  { %v351_v10 = vadd.f32 %v350_v6, %v337_v3  ;;  %v344_v11 = vrot.slane %v336_v7, 4  ;;  %v339_v12 = vmax.f32 %v313_v8, 0.0  ;;  %v308_v13 = vadd.f32 %v611_v63, %v307_v9 }
 0x1af   :  { %v724_v14 = vpop.f32.mrf.mxu1 }
 0x1b0   :  { %v352_v15 = vrot.slane %v351_v10, 2  ;;  %v345_v16 = vadd.f32 %v344_v11, %v336_v7  ;;  %v362_v17 = vrot.slane %v339_v12, 4  ;;  %v338_v18 = vmax.f32 %v308_v13, 0.0 }
 0x1b1   :  { %v323_v19 = vadd.f32 %v724_v14, %v611_v63  ;;  %v317_v20 = vpop.f32.mrf.mxu1 }
 0x1b2   :  { %v346_v21 = vrot.slane %v345_v16, 2  ;;  %v363_v22 = vadd.f32 %v362_v17, %v339_v12  ;;  %v356_v23 = vrot.slane %v338_v18, 4  ;;  %v318_v25 = vadd.f32 %v611_v63, %v317_v20 }
 0x1b3   :  { %v341_v24 = vmax.f32 %v323_v19, 0.0  ;;  %v727_v26 = vpop.f32.mrf.mxu1  ;;  %v353_v27 = vadd.f32 %v352_v15, %v351_v10  ;;  %v480_v15 = vpop.f32.mrf.mxu0 }
 0x1b4   :  { %v347_v28 = vadd.f32 %v346_v21, %v345_v16  ;;  %v364_v29 = vrot.slane %v363_v22, 2  ;;  %v357_v30 = vadd.f32 %v356_v23, %v338_v18  ;;  %v340_v32 = vmax.f32 %v318_v25, 0.0  ;;  %v613_v18 = vld [vmem:[%s996_s8] ss:$0 sm:$0xff] }
 0x1b5   :  { %v374_v31 = vrot.slane %v341_v24, 4  ;;  %v333_v33 = vadd.f32 %v727_v26, %v611_v63  ;;  %v327_v34 = vpop.f32.mrf.mxu1  ;;  %v354_v41 = vrot.slane %v353_v27, 1  ;;  %v734_v16 = vpop.f32.mrf.mxu0 }
 0x1b6   :  { %v348_v35 = vrot.slane %v347_v28, 1  ;;  %v358_v36 = vrot.slane %v357_v30, 2  ;;  %v368_v38 = vrot.slane %v340_v32, 4  ;;  %v328_v40 = vadd.f32 %v611_v63, %v327_v34 }
 0x1b7   :  { %v375_v37 = vadd.f32 %v374_v31, %v341_v24  ;;  %v343_v39 = vmax.f32 %v333_v33, 0.0  ;;  %v365_v42 = vadd.f32 %v364_v29, %v363_v22  ;;  %v355_v53 = vadd.f32 %v354_v41, %v353_v27 }
 0x1b8   :  { %v359_v43 = vadd.f32 %v358_v36, %v357_v30  ;;  %v369_v45 = vadd.f32 %v368_v38, %v340_v32  ;;  %v342_v47 = vmax.f32 %v328_v40, 0.0  ;;  %v349_v48 = vadd.f32 %v348_v35, %v347_v28 }
 0x1b9   :  { %v376_v44 = vrot.slane %v375_v37, 2  ;;  %v386_v46 = vrot.slane %v343_v39, 4  ;;  %v366_v54 = vrot.slane %v365_v42, 1 }
 0x1ba   :  { %v360_v49 = vrot.slane %v359_v43, 1  ;;  %v370_v50 = vrot.slane %v369_v45, 2  ;;  %v380_v52 = vrot.slane %v342_v47, 4  ;;  %v493_v60 = vsel %vm492_vm2, %v355_v53, %v349_v48 }
 0x1bb   :  { %v387_v51 = vadd.f32 %v386_v46, %v343_v39  ;;  %v377_v56 = vadd.f32 %v376_v44, %v375_v37  ;;  %v367_v1 = vadd.f32 %v366_v54, %v365_v42 }
 0x1bc   :  { %v361_v55 = vadd.f32 %v360_v49, %v359_v43  ;;  %v371_v57 = vadd.f32 %v370_v50, %v369_v45  ;;  %v381_v59 = vadd.f32 %v380_v52, %v342_v47 }
 0x1bd   :  { %v388_v58 = vrot.slane %v387_v51, 2  ;;  %v378_v2 = vrot.slane %v377_v56, 1 }
 0x1be   :  { %v495_v61 = vsel %vm494_vm3, %v361_v55, %v493_v60  ;;  %v372_v62 = vrot.slane %v371_v57, 1  ;;  %v382_v0 = vrot.slane %v381_v59, 2 }
 0x1bf   :  { %v389_v63 = vadd.f32 %v388_v58, %v387_v51  ;;  %v497_v6 = vsel %vm496_vm4, %v367_v1, %v495_v61  ;;  %v379_v9 = vadd.f32 %v378_v2, %v377_v56 }
 0x1c0   :  { %v373_v3 = vadd.f32 %v372_v62, %v371_v57  ;;  %v383_v4 = vadd.f32 %v382_v0, %v381_v59 }
 0x1c1   :  { %v390_v5 = vrot.slane %v389_v63, 1 }
 0x1c2   :  { %v384_v7 = vrot.slane %v383_v4, 1  ;;  %v499_v8 = vsel %vm498_vm5, %v373_v3, %v497_v6 }
 0x1c3   :  { %v391_v11 = vadd.f32 %v390_v5, %v389_v63  ;;  %v501_v12 = vsel %vm500_vm6, %v379_v9, %v499_v8 }
 0x1c4   :  { %v385_v10 = vadd.f32 %v384_v7, %v383_v4 }
 0x1c6   :  { %v503_v13 = vsel %vm502_vm7, %v385_v10, %v501_v12 }
 0x1c7   :  { %v505_v14 = vsel %vm504_vm8, %v391_v11, %v503_v13 }
 0x1c8   :  { %768 = vmatmul.mubr.f32.vlgmr.msra.gmra.mxu0 %v505_v14 }
 0x288   :  { %v573_v17 = vpop.f32.mrf.mxu0 }
 0x289   :  { %v574_v19 = vadd.f32 %v573_v17, %v480_v15 }
 0x28a   :  { %v769_v20 = vpop.f32.mrf.mxu0 }
 0x28b   :  { %v584_v21 = vadd.f32 %v613_v18, %v574_v19 }
 0x28d   :  { %585 = vst [vmem:[#allocation7] sm:$0xff] %v584_v21 }
 0x28e   :  { %828 = shalt.err (!%p825_p0)
}
 0x28f   :  { %595 = dma.vmem_to_hbm [thread:$0]  %s593_s24, 128, %s997_s9, [#allocation4]  }
 0x290   :  { %841 = dma.done.wait [#allocation4], 128  }
 0x291   :  { %842 = vsyncadd [#allocation4], 4294967168 }
 0x292   :  { %599 = vsyncpa [#allocation3], 1 }
 0x293   :  { %600 = vsyncpa [#allocation6], 1 }
 0x294   :  { %601 = vsyncpa [#allocation4], 1 }

</bundles_post_ra>
